<compile_context>
chip_gen: v7x
topology: tpu7x:2x2x1
jax: 0.10.0
libtpu: 0.0.40
codegen_flags: <defaults>
</compile_context>

<pallas_src>
import jax
import jax.numpy as jnp
from jax.experimental import pallas as pl
from jax.experimental.pallas import tpu as pltpu

_TM_MAX = 256    # dst-row tile (sublane axis of A / output rows)
_TK_MAX = 1024   # src reduction tile (lane axis of A)
_LANE = 128


def _round_up(x, m):
    return ((x + m - 1) // m) * m


def _pad2(x, rows, cols):
    r, c = x.shape
    return jnp.pad(x, ((0, rows - r), (0, cols - c)))


def _sage_layer_kernel(a_ref, xs_ref, xd_ref, dinv_ref, w_ref, b_ref,
                       out_ref, acc_ref, hin_ref):
    """Fused SAGEConv(mean) + tanh over one (row-tile, src-tile) grid step.

    a_ref    : (TM, TK)        bf16 0/1(count) adjacency tile
    xs_ref   : (TK, Dp)        bf16 source features
    xd_ref   : (TM, Dp)        bf16 destination (root) features
    dinv_ref : (TM, 1)         f32  1/deg per destination row
    w_ref    : (2*Dp, DOp)     bf16 stacked [W_l; W_r]
    b_ref    : (1, DOp)        f32  bias
    out_ref  : (TM, DOp)       bf16 output tile (resident across reduction axis)
    acc_ref  : (TM, Dp)   f32  scratch accumulator for sum of neighbor features
    hin_ref  : (TM, 2*Dp) bf16 scratch for fused [agg | x_dst] matmul input
    """
    k = pl.program_id(1)

    @pl.when(k == 0)
    def _():
        acc_ref[...] = jnp.zeros_like(acc_ref)

    # Neighbor-sum: 0/1 adjacency tile @ source features, f32 accumulation (MXU).
    acc_ref[...] += jnp.dot(a_ref[...], xs_ref[...],
                            preferred_element_type=jnp.float32)

    @pl.when(k == pl.num_programs(1) - 1)
    def _():
        d = xd_ref.shape[1]
        # Mean normalization on the VPU (hidden under the MXU work).
        agg = acc_ref[...] * dinv_ref[...]
        # Fuse the two skinny GEMMs into one K=2*Dp matmul: [agg | x_dst] @ [W_l; W_r].
        hin_ref[:, :d] = agg.astype(hin_ref.dtype)
        hin_ref[:, d:] = xd_ref[...]
        h = jnp.dot(hin_ref[...], w_ref[...],
                    preferred_element_type=jnp.float32)
        h = h + b_ref[...]
        out_ref[...] = jnp.tanh(h).astype(out_ref.dtype)


def sage_layer(a, x_src, x_dst, dinv, w_cat, b, tm, tk):
    """One fused SAGEConv + tanh layer on padded operands.

    a:     [n_dst_p, n_src_p] bf16  0/1(count) adjacency
    x_src: [n_src_p, d_p]     bf16
    x_dst: [n_dst_p, d_p]     bf16
    dinv:  [n_dst_p, 1]       f32   1/deg
    w_cat: [2*d_p, d_out_p]   bf16  stacked [W_l; W_r]
    b:     [1, d_out_p]       f32
    returns [n_dst_p, d_out_p] bf16
    """
    n_dst_p, n_src_p = a.shape
    d_p = x_src.shape[1]
    d_out_p = w_cat.shape[1]
    grid = (n_dst_p // tm, n_src_p // tk)

    return pl.pallas_call(
        _sage_layer_kernel,
        out_shape=jax.ShapeDtypeStruct((n_dst_p, d_out_p), jnp.bfloat16),
        grid_spec=pltpu.PrefetchScalarGridSpec(
            num_scalar_prefetch=0,
            grid=grid,
            in_specs=[
                pl.BlockSpec((tm, tk), lambda i, k: (i, k)),            # A tile
                pl.BlockSpec((tk, d_p), lambda i, k: (k, 0)),           # X_src tile
                pl.BlockSpec((tm, d_p), lambda i, k: (i, 0)),           # X_dst tile
                pl.BlockSpec((tm, 1), lambda i, k: (i, 0)),             # 1/deg
                pl.BlockSpec((2 * d_p, d_out_p), lambda i, k: (0, 0)),  # [W_l; W_r]
                pl.BlockSpec((1, d_out_p), lambda i, k: (0, 0)),        # bias
            ],
            out_specs=pl.BlockSpec((tm, d_out_p), lambda i, k: (i, 0)),
            scratch_shapes=[
                pltpu.VMEM((tm, d_p), jnp.float32),        # neighbor-sum accumulator
                pltpu.VMEM((tm, 2 * d_p), jnp.bfloat16),   # fused matmul input
            ],
        ),
        compiler_params=pltpu.CompilerParams(
            dimension_semantics=("parallel", "arbitrary"),
            vmem_limit_bytes=32 * 1024 * 1024,
        ),
    )(a, x_src, x_dst, dinv, w_cat, b)


def build_adjacency(edge_index, n_src_pad, n_dst_pad):
    """Dense 0/1(count) adjacency (exact in bf16) + f32 inverse degree.

    A @ X gives the neighbor *sum*; the mean normalization (1/deg) is applied
    in-kernel in f32. Duplicate edges are counted in both numerator and
    denominator, matching PyG scatter-mean.
    """
    src = edge_index[0]
    dst = edge_index[1]
    counts = jnp.zeros((n_dst_pad, n_src_pad), jnp.float32).at[dst, src].add(1.0)
    deg = counts.sum(axis=1, keepdims=True)
    dinv = 1.0 / jnp.maximum(deg, 1.0)  # isolated targets -> agg of 0 (matches PyG mean)
    return counts.astype(jnp.bfloat16), dinv.astype(jnp.float32)


def graphsage_forward(nodes, edge_list, params):
    """Mirror of _GraphSAGE.forward (tanh after every SAGEConv, incl. the last).

    nodes:     [N0, d_in] float
    edge_list: list of (edge_index [2, E], size (n_src, n_dst)) per hop.
    params:    list of (w_l, w_r, b) per SAGEConv layer.
    """
    for (edge_index, size), (w_l, w_r, b) in zip(edge_list, params):
        n_src = nodes.shape[0]
        n_dst = int(size[1])
        d_in = nodes.shape[1]
        d_out = w_l.shape[1]

        d_in_p = _round_up(d_in, _LANE)
        d_out_p = _round_up(d_out, _LANE)
        tm = min(_TM_MAX, _round_up(n_dst, 8))
        tk = min(_TK_MAX, _round_up(n_src, _LANE))
        n_dst_p = _round_up(n_dst, tm)
        n_src_p = _round_up(n_src, tk)

        x_src = _pad2(nodes, n_src_p, d_in_p).astype(jnp.bfloat16)
        x_dst = _pad2(nodes[:n_dst], n_dst_p, d_in_p).astype(jnp.bfloat16)
        a, dinv = build_adjacency(edge_index, n_src_p, n_dst_p)
        w_cat = jnp.concatenate(
            [_pad2(w_l, d_in_p, d_out_p), _pad2(w_r, d_in_p, d_out_p)],
            axis=0).astype(jnp.bfloat16)
        b_p = jnp.pad(b, (0, d_out_p - d_out)).reshape(1, d_out_p).astype(jnp.float32)

        out_p = sage_layer(a, x_src, x_dst, dinv, w_cat, b_p, tm, tk)
        nodes = out_p[:n_dst, :d_out]  # bf16, feeds next layer
    return nodes.astype(jnp.float32)


def init_sage_conv(key, d_in, d_out):
    k1, k2, k3 = jax.random.split(key, 3)
    scale = 1.0 / jnp.sqrt(jnp.float32(d_in))
    w_l = jax.random.uniform(k1, (d_in, d_out), jnp.float32, -scale, scale)
    w_r = jax.random.uniform(k2, (d_in, d_out), jnp.float32, -scale, scale)
    b = jax.random.uniform(k3, (d_out,), jnp.float32, -scale, scale)
    return w_l, w_r, b


def _reference_forward(nodes, edge_list, params):
    """Pure-JAX f32 reference of _GraphSAGE.forward (scatter-mean SAGEConv)."""
    for (edge_index, size), (w_l, w_r, b) in zip(edge_list, params):
        n_dst = int(size[1])
        src, dst = edge_index[0], edge_index[1]
        x_dst = nodes[:n_dst]
        summed = jnp.zeros((n_dst, nodes.shape[1]), jnp.float32).at[dst].add(nodes[src])
        cnt = jnp.zeros((n_dst,), jnp.float32).at[dst].add(1.0)
        agg = summed / jnp.maximum(cnt, 1.0)[:, None]
        nodes = jnp.tanh(agg @ w_l + x_dst @ w_r + b)
    return nodes


if __name__ == "__main__":
    key = jax.random.PRNGKey(0)
    input_size, output_size = 32, 32
    n0, n1, n2 = 24, 16, 8          # node counts per hop: sources -> hop1 targets -> hop2 targets
    e1, e2 = 48, 24                 # edges per hop

    keys = jax.random.split(key, 8)
    nodes = jax.random.normal(keys[0], (n0, input_size), jnp.float32)

    src1 = jax.random.randint(keys[1], (e1,), 0, n0)
    dst1 = jax.random.randint(keys[2], (e1,), 0, n1)
    edge_index1 = jnp.stack([src1, dst1], axis=0)

    src2 = jax.random.randint(keys[3], (e2,), 0, n1)
    dst2 = jax.random.randint(keys[4], (e2,), 0, n2)
    edge_index2 = jnp.stack([src2, dst2], axis=0)

    edge_list = [
        (edge_index1, (n0, n1)),
        (edge_index2, (n1, n2)),
    ]

    params = [
        init_sage_conv(keys[5], input_size, output_size),
        init_sage_conv(keys[6], output_size, output_size),
    ]

    out = graphsage_forward(nodes, edge_list, params)
    out = jax.block_until_ready(out)
    assert out.shape == (n2, output_size), out.shape

    ref = _reference_forward(nodes, edge_list, params)
    max_err = float(jnp.max(jnp.abs(out - ref)))
    assert max_err < 7.5e-2, f"max abs error vs f32 reference too large: {max_err}"

    print("KERNEL_OK")
</pallas_src>

<mosaic_0001>
module attributes {stable_mosaic.version = 11 : i64} {
  func.func @_sage_layer_kernel(%arg0: i32, %arg1: i32, %arg2: memref<16x128xbf16, #tpu.memory_space<vmem>>, %arg3: memref<128x128xbf16, #tpu.memory_space<vmem>>, %arg4: memref<16x128xbf16, #tpu.memory_space<vmem>>, %arg5: memref<16x1xf32, #tpu.memory_space<vmem>>, %arg6: memref<256x128xbf16, #tpu.memory_space<vmem>>, %arg7: memref<1x128xf32, #tpu.memory_space<vmem>>, %arg8: memref<16x128xbf16, #tpu.memory_space<vmem>>, %arg9: memref<16x128xf32, #tpu.memory_space<vmem>>, %arg10: memref<16x256xbf16, #tpu.memory_space<vmem>>) attributes {dimension_semantics = [#tpu.dimension_semantics<parallel>, #tpu.dimension_semantics<arbitrary>], iteration_bounds = array<i64: 1, 1>, scalar_prefetch = 0 : i64, scratch_operands = 2 : i64, tpu.core_type = #tpu.core_type<tc>, window_params = [{transform_indices = @transform_0, window_bounds = array<i64: 16, 128>}, {transform_indices = @transform_1, window_bounds = array<i64: 128, 128>}, {transform_indices = @transform_2, window_bounds = array<i64: 16, 128>}, {transform_indices = @transform_3, window_bounds = array<i64: 16, 1>}, {pipeline_mode = #tpu.pipeline_mode<synchronous>, transform_indices = @transform_4, window_bounds = array<i64: 256, 128>}, {pipeline_mode = #tpu.pipeline_mode<synchronous>, transform_indices = @transform_5, window_bounds = array<i64: 1, 128>}, {transform_indices = @transform_6, window_bounds = array<i64: 16, 128>}]} {
    %c0_i32 = arith.constant 0 : i32
    %0 = arith.cmpi eq, %arg1, %c0_i32 : i32
    %1 = arith.extui %0 : i1 to i32
    %c0_i32_0 = arith.constant 0 : i32
    %2 = arith.cmpi ne, %1, %c0_i32_0 : i32
    scf.if %2 {
      %cst_10 = arith.constant 0.000000e+00 : f32
      %12 = vector.broadcast %cst_10 : f32 to vector<16x128xf32>
      %c0_11 = arith.constant 0 : index
      %c0_12 = arith.constant 0 : index
      %13 = vector.load %arg9[%c0_11, %c0_12] : memref<16x128xf32, #tpu.memory_space<vmem>>, vector<16x128xf32>
      tpu.vector_store %arg9[%c0_11, %c0_12], %12 {strides = array<i32>} : memref<16x128xf32, #tpu.memory_space<vmem>>, vector<16x128xf32>,
    } else {
    }
    %c0 = arith.constant 0 : index
    %c0_1 = arith.constant 0 : index
    %3 = vector.load %arg9[%c0, %c0_1] : memref<16x128xf32, #tpu.memory_space<vmem>>, vector<16x128xf32>
    %c0_2 = arith.constant 0 : index
    %c0_3 = arith.constant 0 : index
    %4 = vector.load %arg2[%c0_2, %c0_3] : memref<16x128xbf16, #tpu.memory_space<vmem>>, vector<16x128xbf16>
    %c0_4 = arith.constant 0 : index
    %c0_5 = arith.constant 0 : index
    %5 = vector.load %arg3[%c0_4, %c0_5] : memref<128x128xbf16, #tpu.memory_space<vmem>>, vector<128x128xbf16>
    %cst = arith.constant dense<0.000000e+00> : vector<16x128xf32>
    %6 = tpu.matmul %4, %5, %cst {dimension_numbers = #tpu.dot_dimension_numbers<[1], [0], [0], [1], [0, 0, 1, 1], [], []>} : vector<16x128xbf16>, vector<128x128xbf16>, vector<16x128xf32> -> vector<16x128xf32>
    %7 = arith.addf %3, %6 : vector<16x128xf32>
    %c0_6 = arith.constant 0 : index
    %c0_7 = arith.constant 0 : index
    %8 = vector.load %arg9[%c0_6, %c0_7] : memref<16x128xf32, #tpu.memory_space<vmem>>, vector<16x128xf32>
    tpu.vector_store %arg9[%c0_6, %c0_7], %7 {strides = array<i32>} : memref<16x128xf32, #tpu.memory_space<vmem>>, vector<16x128xf32>,
    %c0_i32_8 = arith.constant 0 : i32
    %9 = arith.cmpi eq, %arg1, %c0_i32_8 : i32
    %10 = arith.extui %9 : i1 to i32
    %c0_i32_9 = arith.constant 0 : i32
    %11 = arith.cmpi ne, %10, %c0_i32_9 : i32
    scf.if %11 {
      %c0_10 = arith.constant 0 : index
      %c0_11 = arith.constant 0 : index
      %12 = vector.load %arg9[%c0_10, %c0_11] : memref<16x128xf32, #tpu.memory_space<vmem>>, vector<16x128xf32>
      %c0_12 = arith.constant 0 : index
      %c0_13 = arith.constant 0 : index
      %13 = vector.load %arg5[%c0_12, %c0_13] : memref<16x1xf32, #tpu.memory_space<vmem>>, vector<16x1xf32>
      %14 = vector.broadcast %13 : vector<16x1xf32> to vector<16x128xf32>
      %15 = arith.mulf %12, %14 : vector<16x128xf32>
      %16 = arith.truncf %15 : vector<16x128xf32> to vector<16x128xbf16>
      %c0_14 = arith.constant 0 : index
      %c0_15 = arith.constant 0 : index
      %17 = vector.load %arg10[%c0_14, %c0_15] : memref<16x256xbf16, #tpu.memory_space<vmem>>, vector<16x128xbf16>
      tpu.vector_store %arg10[%c0_14, %c0_15], %16 {strides = array<i32>} : memref<16x256xbf16, #tpu.memory_space<vmem>>, vector<16x128xbf16>,
      %c0_16 = arith.constant 0 : index
      %c0_17 = arith.constant 0 : index
      %18 = vector.load %arg4[%c0_16, %c0_17] : memref<16x128xbf16, #tpu.memory_space<vmem>>, vector<16x128xbf16>
      %c0_18 = arith.constant 0 : index
      %c128 = arith.constant 128 : index
      %19 = vector.load %arg10[%c0_18, %c128] : memref<16x256xbf16, #tpu.memory_space<vmem>>, vector<16x128xbf16>
      tpu.vector_store %arg10[%c0_18, %c128], %18 {strides = array<i32>} : memref<16x256xbf16, #tpu.memory_space<vmem>>, vector<16x128xbf16>,
      %c0_19 = arith.constant 0 : index
      %c0_20 = arith.constant 0 : index
      %20 = vector.load %arg10[%c0_19, %c0_20] : memref<16x256xbf16, #tpu.memory_space<vmem>>, vector<16x256xbf16>
      %c0_21 = arith.constant 0 : index
      %c0_22 = arith.constant 0 : index
      %21 = vector.load %arg6[%c0_21, %c0_22] : memref<256x128xbf16, #tpu.memory_space<vmem>>, vector<256x128xbf16>
      %cst_23 = arith.constant dense<0.000000e+00> : vector<16x128xf32>
      %22 = tpu.matmul %20, %21, %cst_23 {dimension_numbers = #tpu.dot_dimension_numbers<[1], [0], [0], [1], [0, 0, 1, 1], [], []>} : vector<16x256xbf16>, vector<256x128xbf16>, vector<16x128xf32> -> vector<16x128xf32>
      %c0_24 = arith.constant 0 : index
      %c0_25 = arith.constant 0 : index
      %23 = vector.load %arg7[%c0_24, %c0_25] : memref<1x128xf32, #tpu.memory_space<vmem>>, vector<1x128xf32>
      %24 = vector.broadcast %23 : vector<1x128xf32> to vector<16x128xf32>
      %25 = arith.addf %22, %24 : vector<16x128xf32>
      %26 = math.tanh %25 : vector<16x128xf32>
      %27 = arith.truncf %26 : vector<16x128xf32> to vector<16x128xbf16>
      %c0_26 = arith.constant 0 : index
      %c0_27 = arith.constant 0 : index
      %28 = vector.load %arg8[%c0_26, %c0_27] : memref<16x128xbf16, #tpu.memory_space<vmem>>, vector<16x128xbf16>
      tpu.vector_store %arg8[%c0_26, %c0_27], %27 {strides = array<i32>} : memref<16x128xbf16, #tpu.memory_space<vmem>>, vector<16x128xbf16>,
    } else {
    }
    return
  }
  func.func @transform_0(%arg0: i32, %arg1: i32) -> (i32, i32) {
    %c0_i32 = arith.constant 0 : i32
    return %arg0, %arg1 : i32, i32
  }
  func.func @transform_1(%arg0: i32, %arg1: i32) -> (i32, i32) {
    %c0_i32 = arith.constant 0 : i32
    %c0_i32_0 = arith.constant 0 : i32
    return %arg1, %c0_i32 : i32, i32
  }
  func.func @transform_2(%arg0: i32, %arg1: i32) -> (i32, i32) {
    %c0_i32 = arith.constant 0 : i32
    %c0_i32_0 = arith.constant 0 : i32
    return %arg0, %c0_i32 : i32, i32
  }
  func.func @transform_3(%arg0: i32, %arg1: i32) -> (i32, i32) {
    %c0_i32 = arith.constant 0 : i32
    %c0_i32_0 = arith.constant 0 : i32
    return %arg0, %c0_i32 : i32, i32
  }
  func.func @transform_4(%arg0: i32, %arg1: i32) -> (i32, i32) {
    %c0_i32 = arith.constant 0 : i32
    %c0_i32_0 = arith.constant 0 : i32
    %c0_i32_1 = arith.constant 0 : i32
    return %c0_i32, %c0_i32_0 : i32, i32
  }
  func.func @transform_5(%arg0: i32, %arg1: i32) -> (i32, i32) {
    %c0_i32 = arith.constant 0 : i32
    %c0_i32_0 = arith.constant 0 : i32
    %c0_i32_1 = arith.constant 0 : i32
    return %c0_i32, %c0_i32_0 : i32, i32
  }
  func.func @transform_6(%arg0: i32, %arg1: i32) -> (i32, i32) {
    %c0_i32 = arith.constant 0 : i32
    %c0_i32_0 = arith.constant 0 : i32
    return %arg0, %c0_i32 : i32, i32
  }
}

</mosaic_0001>

<bundles_post_ra>
// kernel: tpu_custom_call.1
= control target key start
LH: loop header
LB: loop body
LE: loop exit
PB: predicated region body
PF: predicated region fallthrough
CT: control target
= control target key end

     0   :  { %11 = vsyncpa [#allocation5], 0  ;;  %s717_s0 = inlined_call_operand.vmem [shape: bf16[16,128], index: 0, kind: input, shape index: {}]   ;;  %s718_s1 = inlined_call_operand.hbm [shape: bf16[128,128], index: 1, kind: input, shape index: {}]   ;;  %s719_s2 = inlined_call_operand.vmem [shape: bf16[16,128], index: 2, kind: input, shape index: {}]   ;;  %s720_s3 = inlined_call_operand.vmem [shape: f32[16,1], index: 3, kind: input, shape index: {}]   ;;  %s721_s4 = inlined_call_operand.hbm [shape: bf16[256,128], index: 4, kind: input, shape index: {}]   ;;  %s722_s5 = inlined_call_operand.vmem [shape: f32[1,128], index: 5, kind: input, shape index: {}]   ;;  %s723_s6 = inlined_call_operand.hbm [shape: bf16[16,128], index: 6, kind: output, shape index: {}]  }
   0x1   :  { %12 = vsyncpa [#allocation8], 0 }
   0x2   :  { %13 = vsyncpa [#allocation6], 0  ;;  %s614_s21 = smov [#allocation4]   ;;  %s542_s25 = scalar_lea.hbm %s718_s1, 1024 }
   0x3   :  { %s21_s22 = sshll.u32 %s614_s21, 4  ;;  %p543_p0 = scmp.ne.s32.totalorder %s718_s1, %s542_s25  ;;  %s22_s22 = int_to_ptr.vmem [resolvable:$true] %s21_s22 }
   0x4   :  { %p546_p1 = scmp.lt.u32.totalorder %s542_s25, %s718_s1 }
   0x6   :  { %p548_p2 = pnand %p546_p1, %p543_p0 }
   0x8   :  { %551 = shalt.err (!%p548_p2)
}
   0x9   :  { %s552_s30 = scalar_lea.vmem %s22_s22, 1024  ;;  %p557_p4 = scmp.lt.s32.totalorder %s22_s22, %s22_s22 }
   0xa   :  { %p553_p3 = scmp.ne.s32.totalorder %s22_s22, %s552_s30  ;;  %p558_p5 = scmp.lt.s32.totalorder %s552_s30, %s552_s30 }
   0xc   :  { %p559_p6 = por %p558_p5, %p557_p4 }
   0xe   :  { %p560_p7 = pnand %p559_p6, %p553_p3 }
  0x10   :  { %563 = shalt.err (!%p560_p7)
}
  0x11   :  { %s615_s7 = smov 64   ;;  %s616_s8 = smov 4  }
  0x12   :  { %27 = dma.hbm_to_vmem [thread:$0]  %s718_s1, 1024, %s22_s22, [#allocation5], %s615_s7, %s615_s7, %s616_s8  }
  0x13   :  { %s617_s11 = smov [#allocation7]   ;;  %s564_s15 = scalar_lea.hbm %s721_s4, 2048 }
  0x14   :  { %s37_s12 = sshll.u32 %s617_s11, 4  ;;  %p565_p8 = scmp.ne.s32.totalorder %s721_s4, %s564_s15  ;;  %s38_s12 = int_to_ptr.vmem [resolvable:$true] %s37_s12 }
  0x15   :  { %p568_p9 = scmp.lt.u32.totalorder %s564_s15, %s721_s4 }
  0x17   :  { %p570_p10 = pnand %p568_p9, %p565_p8 }
  0x19   :  { %573 = shalt.err (!%p570_p10)
}
  0x1a   :  { %s574_s20 = scalar_lea.vmem %s38_s12, 2048  ;;  %p579_p12 = scmp.lt.s32.totalorder %s38_s12, %s38_s12 }
  0x1b   :  { %p575_p11 = scmp.ne.s32.totalorder %s38_s12, %s574_s20  ;;  %p580_p13 = scmp.lt.s32.totalorder %s574_s20, %s574_s20 }
  0x1d   :  { %p581_p0 = por %p580_p13, %p579_p12 }
  0x1f   :  { %p582_p1 = pnand %p581_p0, %p575_p11 }
  0x21   :  { %585 = shalt.err (!%p582_p1)
}
  0x22   :  { %43 = dma.hbm_to_vmem [thread:$0]  %s721_s4, 2048, %s38_s12, [#allocation8], %s615_s7, %s615_s7, %s616_s8  }
  0x23   :  { %608 = dma.done.wait [#allocation5], 1024  }
  0x24   :  { %609 = vsyncadd [#allocation5], 4294966272 }
  0x25   :  { %610 = dma.done.wait [#allocation8], 2048  }
  0x26   :  { %611 = vsyncadd [#allocation8], 4294965248  ;;  %v618_v0 = vmov 0.0   ;;  %vm619_vm0 = vmmov 0   ;;  %v620_v1 = vmov 0   ;;  %v512_v2 = vld [vmem:[#allocation4] sm:$0xff]  }
  0x27   :  { %483 = vmatprep.subr.bf16.mxu0 %v618_v0  ;;  %499 = vmatprep.mubr.msk.bf16.mxu0 %vm619_vm0, %v618_v0  ;;  %v513_v3 = vld [vmem:[#allocation4 + $0x8] sm:$0xff]   ;;  %v514_v4 = vld [vmem:[#allocation4 + $0x10] sm:$0xff]   ;;  %v515_v5 = vld [vmem:[#allocation4 + $0x18] sm:$0xff]  }
  0x28   :  { %511 = vset.pattern.permute.xlu0 %v620_v1  ;;  %484 = vmatpush3.bf16.msra.mxu0 %v512_v2  ;;  %v183_v6 = vld [vmem:[%s720_s3] sm:$0xff]  ;;  %v184_v7 = vld [vmem:[%s720_s3 + $0x8] sm:$0xff]  ;;  %v525_v13 = vld [vmem:[#allocation7 + $0x50] sm:$0xff]  }
  0x29   :  { %485 = vmatprep.subr.bf16.mxu0 %v618_v0  ;;  %187 = vperm.xlu0 %511, %v183_v6   ;;  %v521_v8 = vld [vmem:[#allocation7 + $0x40] sm:$0xff]   ;;  %v523_v11 = vld [vmem:[#allocation7 + $0x48] sm:$0xff]   ;;  %v526_v15 = vld [vmem:[#allocation7 + $0x10] sm:$0xff]  }
  0x2a   :  { %v522_v9 = vld [vmem:[#allocation7] sm:$0xff]   ;;  %461 = vmatprep.subr.bf16.mxu1 %v521_v8  ;;  %v524_v12 = vld [vmem:[#allocation7 + $0x8] sm:$0xff]   ;;  %v527_v16 = vld [vmem:[#allocation7 + $0x58] sm:$0xff]  }
  0x2b   :  { %v516_v10 = vld [vmem:[#allocation4 + $0x20] sm:$0xff]   ;;  %462 = vmatpush3.bf16.msra.mxu1 %v522_v9  ;;  %v517_v14 = vld [vmem:[#allocation4 + $0x28] sm:$0xff]   ;;  %v518_v17 = vld [vmem:[#allocation4 + $0x30] sm:$0xff]  }
  0x2c   :  { %486 = vmatpush3.bf16.msra.mxu0 %v513_v3  ;;  %463 = vmatprep.subr.bf16.mxu1 %v523_v11  ;;  %v528_v18 = vld [vmem:[#allocation7 + $0x18] sm:$0xff]   ;;  %v529_v19 = vld [vmem:[#allocation7 + $0x60] sm:$0xff]   ;;  %v531_v22 = vld [vmem:[#allocation7 + $0x68] sm:$0xff]  }
  0x2d   :  { %487 = vmatprep.subr.bf16.mxu0 %v618_v0  ;;  %192 = vperm.xlu0 %511, %v184_v7   ;;  %v530_v20 = vld [vmem:[#allocation7 + $0x20] sm:$0xff]   ;;  %v519_v21 = vld [vmem:[#allocation4 + $0x38] sm:$0xff]   ;;  %v532_v24 = vld [vmem:[#allocation7 + $0x28] sm:$0xff]  }
  0x2e   :  { %v520_v23 = vld [vmem:[%s717_s0] sm:$0xff]   ;;  %v533_v25 = vld [vmem:[#allocation7 + $0x70] sm:$0xff]   ;;  %v535_v27 = vld [vmem:[#allocation7 + $0x78] sm:$0xff]  }
  0x2f   :  { %464 = vmatpush3.bf16.msra.mxu1 %v524_v12  ;;  %v534_v26 = vld [vmem:[#allocation7 + $0x30] sm:$0xff]   ;;  %v536_v28 = vld [vmem:[#allocation7 + $0x38] sm:$0xff]   ;;  %v537_v29 = vld [vmem:[%s719_s2] sm:$0xff]   ;;  %s621_s2 = smov [#allocation9]  }
  0x30   :  { %488 = vmatpush3.bf16.msra.mxu0 %v514_v4  ;;  %465 = vmatprep.subr.bf16.mxu1 %v525_v13  ;;  %v426_v40 = vld [vmem:[%s722_s5] ss:$0 sm:$0xff]  ;;  %s403_s29 = sshll.u32 %s621_s2, 4  ;;  %s404_s29 = int_to_ptr.vmem [resolvable:$true] %s403_s29 }
  0x31   :  { %489 = vmatprep.subr.bf16.mxu0 %v618_v0  ;;  %377 = vmatprep.mubr.bf16.mxu1 %v537_v29  ;;  %s586_s30 = scalar_lea.vmem %s404_s29, 128  ;;  %p591_p3 = scmp.lt.s32.totalorder %s404_s29, %s404_s29 }
  0x32   :  { %p587_p2 = scmp.ne.s32.totalorder %s404_s29, %s586_s30  ;;  %p592_p4 = scmp.lt.s32.totalorder %s586_s30, %s586_s30 }
  0x33   :  { %466 = vmatpush3.bf16.msra.mxu1 %v526_v15 }
  0x34   :  { %490 = vmatpush3.bf16.msra.mxu0 %v515_v5  ;;  %467 = vmatprep.subr.bf16.mxu1 %v527_v16  ;;  %p593_p5 = por %p592_p4, %p591_p3 }
  0x35   :  { %491 = vmatprep.subr.bf16.mxu0 %v618_v0 }
  0x36   :  { %p594_p6 = pnand %p593_p5, %p587_p2 }
  0x37   :  { %468 = vmatpush3.bf16.msra.mxu1 %v528_v18 }
  0x38   :  { %492 = vmatpush3.bf16.msra.mxu0 %v516_v10  ;;  %469 = vmatprep.subr.bf16.mxu1 %v529_v19 }
  0x39   :  { %493 = vmatprep.subr.bf16.mxu0 %v618_v0 }
  0x3b   :  { %470 = vmatpush3.bf16.msra.mxu1 %v530_v20 }
  0x3c   :  { %494 = vmatpush3.bf16.msra.mxu0 %v517_v14  ;;  %471 = vmatprep.subr.bf16.mxu1 %v531_v22 }
  0x3d   :  { %495 = vmatprep.subr.bf16.mxu0 %v618_v0 }
  0x3f   :  { %472 = vmatpush3.bf16.msra.mxu1 %v532_v24 }
  0x40   :  { %496 = vmatpush3.bf16.msra.mxu0 %v518_v17  ;;  %473 = vmatprep.subr.bf16.mxu1 %v533_v25 }
  0x41   :  { %497 = vmatprep.subr.bf16.mxu0 %v618_v0 }
  0x43   :  { %474 = vmatpush3.bf16.msra.mxu1 %v534_v26 }
  0x44   :  { %498 = vmatpush3.bf16.msra.mxu0 %v519_v21  ;;  %475 = vmatprep.subr.bf16.mxu1 %v535_v27 }
  0x47   :  { %500 = vmatmul.mubr.bf16.vlgmr.msra.gmra.mrb[0].mxu0 %v520_v23  ;;  %476 = vmatpush3.bf16.msra.mxu1 %v536_v28 }
  0xa8   :  { %v188_v30 = vpop.permute.xlu0 %187 }
  0xac   :  { %v193_v33 = vpop.permute.xlu0 %192 }
 0x11a   :  { %v167_v31 = vpop.f32.mrb[0].mxu0 }
 0x11b   :  { %v501_v32 = vpop.f32.mrb[1].mxu0  ;;  %v195_v35 = vmul.f32 %v188_v30, %v167_v31 }
 0x11c   :  { %v170_v34 = vpop.f32.mrb[2].mxu0 }
 0x11d   :  { %v196_v36 = vmul.f32 %v193_v33, %v170_v34  ;;  %v502_v37 = vpop.f32.mrb[3].mxu0 }
 0x11f   :  { %v197_v38 = vpack.c.bf16 %v196_v36, %v195_v35 }
 0x121   :  { %378 = vmatmul.mubr.bf16.vlgmr.msra.gmra.mrb[0].mxu1 %v197_v38 }
 0x1f4   :  { %v477_v39 = vpop.f32.mrb[0].mxu1 }
 0x1f5   :  { %v478_v41 = vpop.f32.mrb[1].mxu1 }
 0x1f6   :  { %v479_v42 = vadd.f32 %v478_v41, %v477_v39  ;;  %v480_v43 = vpop.f32.mrb[2].mxu1 }
 0x1f7   :  { %v481_v44 = vpop.f32.mrb[3].mxu1 }
 0x1f8   :  { %v380_v45 = vadd.f32 %v479_v42, %v426_v40  ;;  %v482_v46 = vadd.f32 %v481_v44, %v480_v43 }
 0x1fa   :  { %v383_v47 = vadd.f32 %v482_v46, %v426_v40  ;;  %538 = vtanh.f32 %v380_v45 }
 0x1fc   :  { %540 = vtanh.f32 %v383_v47 }
 0x204   :  { %v539_v48 = vpop.eup %538 }
 0x206   :  { %v541_v49 = vpop.eup %540 }
 0x207   :  { %v450_v50 = vpack.c.bf16 %v541_v49, %v539_v48 }
 0x209   :  { %451 = vst [vmem:[#allocation9] sm:$0xff] %v450_v50  }
 0x20a   :  { %597 = shalt.err (!%p594_p6)
}
 0x20b   :  { %s598_s10 = scalar_lea.hbm %s723_s6, 128 }
 0x20c   :  { %p599_p7 = scmp.ne.s32.totalorder %s723_s6, %s598_s10  ;;  %p602_p8 = scmp.lt.u32.totalorder %s598_s10, %s723_s6 }
 0x20e   :  { %p604_p9 = pnand %p602_p8, %p599_p7 }
 0x210   :  { %607 = shalt.err (!%p604_p9)
}
 0x211   :  { %409 = dma.vmem_to_hbm [thread:$0]  %s404_s29, 128, %s723_s6, [#allocation6], %s615_s7, %s615_s7, %s616_s8  }
 0x212   :  { %612 = dma.done.wait [#allocation6], 128  }
 0x213   :  { %613 = vsyncadd [#allocation6], 4294967168 }
 0x214   :  { %413 = vsyncpa [#allocation5], 1 }
 0x215   :  { %414 = vsyncpa [#allocation8], 1 }
 0x216   :  { %415 = vsyncpa [#allocation6], 1 }

</bundles_post_ra>
